<compile_context>
chip_gen: v7x
topology: tpu7x:2x2x1
jax: 0.10.0
libtpu: 0.0.40
codegen_flags: <defaults>
</compile_context>

<pallas_src>
import functools

import jax
import jax.numpy as jnp
from jax.experimental import pallas as pl
from jax.experimental.pallas import tpu as pltpu


def _round_up(x, m):
    return ((x + m - 1) // m) * m


def _tpu_generation_info():
    """(per-TensorCore VMEM bytes, TensorCores per chip) from device_kind."""
    kind = ""
    try:
        kind = jax.devices()[0].device_kind.lower()
    except Exception:
        pass
    is_v7 = ("v7" in kind) or ("tpu7" in kind) or ("7x" in kind)
    if is_v7:
        # v7x: 64 MiB VMEM per TensorCore, 2 TensorCores per chip.
        return 64 * 1024 * 1024, 2
    # v4 / v5e / v5p / v6e: 128 MiB VMEM, 1 TensorCore per chip.
    return 128 * 1024 * 1024, 1


def _bytes_per_tile_row(hidden, in_bytes, out_bytes):
    # VMEM per tile row in one pipeline stage: double-buffered input and output
    # blocks plus ~5 full-tile f32 intermediates materialized in the body
    # (x in f32, centered x, normalized x, affine result, output cast).
    return hidden * (2 * in_bytes + 2 * out_bytes + 5 * 4)


def _choose_tile_rows(rows, hidden, in_bytes, out_bytes, budget_bytes,
                      row_align, min_steps, min_block_bytes=2 * 1024 * 1024):
    bytes_per_row = _bytes_per_tile_row(hidden, in_bytes, out_bytes)
    by_vmem = max(row_align,
                  (budget_bytes // max(bytes_per_row, 1)) // row_align * row_align)
    rows_aligned = _round_up(rows, row_align)
    tile = min(by_vmem, rows_aligned)
    # Prefer at least `min_steps` grid steps (DMA pipelining + both v7x
    # TensorCores via the "parallel" row axis), but never shrink a step's
    # input block below the DMA-efficiency knee (~2 MiB).
    if pl.cdiv(rows, tile) < min_steps:
        candidate = _round_up(max(1, pl.cdiv(rows, min_steps)), row_align)
        if candidate * hidden * in_bytes >= min_block_bytes:
            tile = min(tile, candidate)
    return max(tile, row_align)


def _normalize(x, hidden, eps, two_pass):
    """Row-wise normalization of a (tile_rows, hidden) f32 block."""
    inv_h = jnp.float32(1.0 / hidden)
    mean = jnp.sum(x, axis=-1, keepdims=True) * inv_h
    if two_pass:
        # f32 inputs: numerically safer; identical to E[x^2]-mean^2 exactly.
        xc = x - mean
        var = jnp.sum(xc * xc, axis=-1, keepdims=True) * inv_h
    else:
        # Sub-32-bit inputs: single pass, matches the module math and avoids
        # materializing xc for the variance reduction.
        mean_x2 = jnp.sum(x * x, axis=-1, keepdims=True) * inv_h
        var = mean_x2 - mean * mean
        xc = x - mean
    return xc * jax.lax.rsqrt(var + jnp.float32(eps))


def _layernorm_affine_kernel(x_ref, w_ref, b_ref, o_ref, *, eps, hidden, two_pass):
    x = x_ref[...].astype(jnp.float32)
    x_norm = _normalize(x, hidden, eps, two_pass)
    w = w_ref[...].astype(jnp.float32)   # (1, H) broadcasts over rows
    b = b_ref[...].astype(jnp.float32)
    o_ref[...] = (w * x_norm + b).astype(o_ref.dtype)


def _layernorm_plain_kernel(x_ref, o_ref, *, eps, hidden, two_pass):
    x = x_ref[...].astype(jnp.float32)
    o_ref[...] = _normalize(x, hidden, eps, two_pass).astype(o_ref.dtype)


def layer_norm(x, weight, bias, normalized_shape, eps=1e-5,
               elementwise_affine=True):
    """Pallas LayerNorm matching the PyTorch module's forward semantics."""
    if isinstance(normalized_shape, int):
        normalized_shape = (normalized_shape,)
    normalized_shape = tuple(normalized_shape)
    assert x.shape[-len(normalized_shape):] == normalized_shape

    orig_shape = x.shape
    orig_dtype = x.dtype
    hidden = 1
    for d in normalized_shape:
        hidden *= d
    rows = x.size // hidden

    # View as a 2-D [rows, hidden] slab; no padding of the activation tensor.
    x2d = x.reshape(rows, hidden)

    in_bytes = x2d.dtype.itemsize
    out_bytes = jnp.dtype(orig_dtype).itemsize
    # Sublane alignment for the row axis: 8 for 4-byte, 16 for 2-byte dtypes.
    row_align = max(8, 32 // max(in_bytes, 1))
    # Two-pass variance for f32 inputs; single-pass (module-exact) otherwise.
    two_pass = in_bytes >= 4

    vmem_cap, num_tc = _tpu_generation_info()
    budget = vmem_cap // 2               # tile-sizing budget (50% of VMEM)
    vmem_limit = (vmem_cap * 3) // 4     # scoped limit (~48 MiB v7x, ~96 MiB v6e)
    min_steps = 2 * num_tc               # 4 on v7x (megacore), 2 on v5e/v6e

    tile_rows = _choose_tile_rows(rows, hidden, in_bytes, out_bytes,
                                  budget, row_align, min_steps)

    # Guard for very large hidden: if even the minimal tile's estimated peak
    # exceeds the scoped limit, raise the limit toward physical capacity.
    est_peak = tile_rows * _bytes_per_tile_row(hidden, in_bytes, out_bytes)
    if est_peak + (4 << 20) > vmem_limit:
        vmem_limit = min(int(vmem_cap * 9 // 10), est_peak + (8 << 20))

    grid = (pl.cdiv(rows, tile_rows),)

    x_spec = pl.BlockSpec((tile_rows, hidden), lambda i: (i, 0))
    out_spec = pl.BlockSpec((tile_rows, hidden), lambda i: (i, 0))

    if elementwise_affine:
        w2d = weight.reshape(1, hidden)
        b2d = bias.reshape(1, hidden)
        kernel = functools.partial(_layernorm_affine_kernel, eps=eps,
                                   hidden=hidden, two_pass=two_pass)
        in_specs = [
            x_spec,
            pl.BlockSpec((1, hidden), lambda i: (0, 0)),
            pl.BlockSpec((1, hidden), lambda i: (0, 0)),
        ]
        args = (x2d, w2d, b2d)
    else:
        kernel = functools.partial(_layernorm_plain_kernel, eps=eps,
                                   hidden=hidden, two_pass=two_pass)
        in_specs = [x_spec]
        args = (x2d,)

    out2d = pl.pallas_call(
        kernel,
        out_shape=jax.ShapeDtypeStruct((rows, hidden), orig_dtype),
        grid_spec=pltpu.PrefetchScalarGridSpec(
            num_scalar_prefetch=0,
            grid=grid,
            in_specs=in_specs,
            out_specs=out_spec,
        ),
        compiler_params=pltpu.CompilerParams(
            dimension_semantics=("parallel",),
            vmem_limit_bytes=int(vmem_limit)),
    )(*args)

    return out2d.reshape(orig_shape)


def _reference_layer_norm(x, weight, bias, eps=1e-5, elementwise_affine=True):
    # Exact math of the PyTorch module's forward (E[x^2] - E[x]^2), f32 compute.
    xf = x.astype(jnp.float32)
    mean = jnp.mean(xf, axis=-1, keepdims=True)
    mean_x2 = jnp.mean(xf * xf, axis=-1, keepdims=True)
    var = mean_x2 - mean * mean
    x_norm = (xf - mean) / jnp.sqrt(var + eps)
    if elementwise_affine:
        x_norm = weight.astype(jnp.float32) * x_norm + bias.astype(jnp.float32)
    return x_norm.astype(x.dtype)


if __name__ == "__main__":
    key = jax.random.PRNGKey(0)
    kx, kw, kb, kx2, kw2, kb2, kx3 = jax.random.split(key, 7)

    # Case 1: hidden=32 — non-multiple-of-128 path (no wrapper pad/slice now).
    batch, seq, hidden = 2, 8, 32
    x = jax.random.normal(kx, (batch, seq, hidden), dtype=jnp.float32)
    weight = jax.random.normal(kw, (hidden,), dtype=jnp.float32) * 0.1 + 1.0
    bias = jax.random.normal(kb, (hidden,), dtype=jnp.float32) * 0.1

    out = jax.block_until_ready(layer_norm(x, weight, bias, hidden, eps=1e-5))
    ref = _reference_layer_norm(x, weight, bias, eps=1e-5)
    assert out.shape == x.shape and out.dtype == x.dtype
    assert jnp.allclose(out, ref, atol=1e-5, rtol=1e-5), "mismatch (case 1)"

    # Case 2: hidden=256 — lane-aligned path.
    batch2, seq2, hidden2 = 4, 16, 256
    x2 = jax.random.normal(kx2, (batch2, seq2, hidden2), dtype=jnp.float32)
    w2 = jax.random.normal(kw2, (hidden2,), dtype=jnp.float32) * 0.1 + 1.0
    b2 = jax.random.normal(kb2, (hidden2,), dtype=jnp.float32) * 0.1

    out2 = jax.block_until_ready(layer_norm(x2, w2, b2, hidden2, eps=1e-5))
    ref2 = _reference_layer_norm(x2, w2, b2, eps=1e-5)
    assert out2.shape == x2.shape and out2.dtype == x2.dtype
    assert jnp.allclose(out2, ref2, atol=1e-5, rtol=1e-5), "mismatch (case 2)"

    # Case 3: bf16 input, elementwise_affine=False — single-pass stats path,
    # no weight/bias args/specs.
    batch3, seq3, hidden3 = 2, 8, 128
    x3 = jax.random.normal(kx3, (batch3, seq3, hidden3), dtype=jnp.bfloat16)
    out3 = jax.block_until_ready(
        layer_norm(x3, None, None, hidden3, eps=1e-5, elementwise_affine=False))
    ref3 = _reference_layer_norm(x3, None, None, eps=1e-5,
                                 elementwise_affine=False)
    assert out3.shape == x3.shape and out3.dtype == x3.dtype
    assert jnp.allclose(out3.astype(jnp.float32), ref3.astype(jnp.float32),
                        atol=2e-2, rtol=2e-2), "mismatch (case 3)"

    print("KERNEL_OK")
</pallas_src>

<mosaic_0001>
module attributes {stable_mosaic.version = 11 : i64} {
  func.func @_layernorm_affine_kernel(%arg0: i32, %arg1: memref<16x32xf32, #tpu.memory_space<vmem>>, %arg2: memref<1x32xf32, #tpu.memory_space<vmem>>, %arg3: memref<1x32xf32, #tpu.memory_space<vmem>>, %arg4: memref<16x32xf32, #tpu.memory_space<vmem>>) attributes {dimension_semantics = [#tpu.dimension_semantics<parallel>], iteration_bounds = array<i64: 1>, scalar_prefetch = 0 : i64, scratch_operands = 0 : i64, tpu.core_type = #tpu.core_type<tc>, window_params = [{transform_indices = @transform_0, window_bounds = array<i64: 16, 32>}, {pipeline_mode = #tpu.pipeline_mode<synchronous>, transform_indices = @transform_1, window_bounds = array<i64: 1, 32>}, {pipeline_mode = #tpu.pipeline_mode<synchronous>, transform_indices = @transform_2, window_bounds = array<i64: 1, 32>}, {transform_indices = @transform_3, window_bounds = array<i64: 16, 32>}]} {
    %c0 = arith.constant 0 : index
    %c0_0 = arith.constant 0 : index
    %0 = vector.load %arg1[%c0, %c0_0] : memref<16x32xf32, #tpu.memory_space<vmem>>, vector<16x32xf32>
    %cst = arith.constant dense<0.000000e+00> : vector<16xf32>
    %1 = vector.multi_reduction <add>, %0, %cst [1] : vector<16x32xf32> to vector<16xf32>
    %2 = vector.shape_cast %1 : vector<16xf32> to vector<16x1xf32>
    %cst_1 = arith.constant 3.125000e-02 : f32
    %3 = vector.broadcast %cst_1 : f32 to vector<16x1xf32>
    %4 = arith.mulf %2, %3 : vector<16x1xf32>
    %5 = vector.broadcast %4 : vector<16x1xf32> to vector<16x32xf32>
    %6 = arith.subf %0, %5 : vector<16x32xf32>
    %7 = arith.mulf %6, %6 : vector<16x32xf32>
    %cst_2 = arith.constant dense<0.000000e+00> : vector<16xf32>
    %8 = vector.multi_reduction <add>, %7, %cst_2 [1] : vector<16x32xf32> to vector<16xf32>
    %9 = vector.shape_cast %8 : vector<16xf32> to vector<16x1xf32>
    %cst_3 = arith.constant 3.125000e-02 : f32
    %10 = vector.broadcast %cst_3 : f32 to vector<16x1xf32>
    %11 = arith.mulf %9, %10 : vector<16x1xf32>
    %cst_4 = arith.constant 9.99999974E-6 : f32
    %12 = vector.broadcast %cst_4 : f32 to vector<16x1xf32>
    %13 = arith.addf %11, %12 : vector<16x1xf32>
    %14 = math.rsqrt %13 : vector<16x1xf32>
    %15 = vector.broadcast %14 : vector<16x1xf32> to vector<16x32xf32>
    %16 = arith.mulf %6, %15 : vector<16x32xf32>
    %c0_5 = arith.constant 0 : index
    %c0_6 = arith.constant 0 : index
    %17 = vector.load %arg2[%c0_5, %c0_6] : memref<1x32xf32, #tpu.memory_space<vmem>>, vector<1x32xf32>
    %c0_7 = arith.constant 0 : index
    %c0_8 = arith.constant 0 : index
    %18 = vector.load %arg3[%c0_7, %c0_8] : memref<1x32xf32, #tpu.memory_space<vmem>>, vector<1x32xf32>
    %19 = vector.broadcast %17 : vector<1x32xf32> to vector<16x32xf32>
    %20 = arith.mulf %19, %16 : vector<16x32xf32>
    %21 = vector.broadcast %18 : vector<1x32xf32> to vector<16x32xf32>
    %22 = arith.addf %20, %21 : vector<16x32xf32>
    %c0_9 = arith.constant 0 : index
    %c0_10 = arith.constant 0 : index
    %23 = vector.load %arg4[%c0_9, %c0_10] : memref<16x32xf32, #tpu.memory_space<vmem>>, vector<16x32xf32>
    tpu.vector_store %arg4[%c0_9, %c0_10], %22 {strides = array<i32>} : memref<16x32xf32, #tpu.memory_space<vmem>>, vector<16x32xf32>,
    return
  }
  func.func @transform_0(%arg0: i32) -> (i32, i32) {
    %c0_i32 = arith.constant 0 : i32
    %c0_i32_0 = arith.constant 0 : i32
    return %arg0, %c0_i32 : i32, i32
  }
  func.func @transform_1(%arg0: i32) -> (i32, i32) {
    %c0_i32 = arith.constant 0 : i32
    %c0_i32_0 = arith.constant 0 : i32
    %c0_i32_1 = arith.constant 0 : i32
    return %c0_i32, %c0_i32_0 : i32, i32
  }
  func.func @transform_2(%arg0: i32) -> (i32, i32) {
    %c0_i32 = arith.constant 0 : i32
    %c0_i32_0 = arith.constant 0 : i32
    %c0_i32_1 = arith.constant 0 : i32
    return %c0_i32, %c0_i32_0 : i32, i32
  }
  func.func @transform_3(%arg0: i32) -> (i32, i32) {
    %c0_i32 = arith.constant 0 : i32
    %c0_i32_0 = arith.constant 0 : i32
    return %arg0, %c0_i32 : i32, i32
  }
}

</mosaic_0001>

<bundles_post_ra>
// kernel: tpu_custom_call.1
= control target key start
LH: loop header
LB: loop body
LE: loop exit
PB: predicated region body
PF: predicated region fallthrough
CT: control target
= control target key end

     0   :  { %8 = vsyncpa [#allocation3], 0  ;;  %s318_s0 = inlined_call_operand.hbm [shape: f32[16,32], index: 0, kind: input, shape index: {}]   ;;  %s319_s1 = inlined_call_operand.hbm [shape: f32[1,32], index: 1, kind: input, shape index: {}]   ;;  %s320_s2 = inlined_call_operand.hbm [shape: f32[1,32], index: 2, kind: input, shape index: {}]   ;;  %s321_s3 = inlined_call_operand.hbm [shape: f32[16,32], index: 3, kind: output, shape index: {}]  }
   0x1   :  { %9 = vsyncpa [#allocation6], 0 }
   0x2   :  { %10 = vsyncpa [#allocation4], 0  ;;  %s225_s12 = smov [#allocation5]   ;;  %s226_s14 = smov [#allocation2]  }
   0x3   :  { %s29_s13 = sshll.u32 %s225_s12, 4  ;;  %s16_s15 = sshll.u32 %s226_s14, 4  ;;  %s30_s13 = int_to_ptr.vmem [resolvable:$true] %s29_s13  ;;  %s251_s15 = int_to_ptr.vmem [resolvable:$true] %s16_s15 }
   0x4   :  { %s131_s18 = scalar_lea.hbm %s319_s1, 16 }
   0x5   :  { %p132_p0 = scmp.ne.s32.totalorder %s319_s1, %s131_s18  ;;  %p135_p1 = scmp.lt.u32.totalorder %s131_s18, %s319_s1 }
   0x7   :  { %p137_p2 = pnand %p135_p1, %p132_p0 }
   0x9   :  { %140 = shalt.err (!%p137_p2)
}
   0xa   :  { %s141_s23 = scalar_lea.vmem %s30_s13, 16  ;;  %s145_s24 = scalar_lea.vmem %s30_s13, 32 }
   0xb   :  { %p142_p3 = scmp.ne.s32.totalorder %s30_s13, %s141_s23  ;;  %p146_p4 = scmp.lt.s32.totalorder %s30_s13, %s30_s13 }
   0xc   :  { %p147_p5 = scmp.lt.s32.totalorder %s145_s24, %s141_s23 }
   0xe   :  { %p148_p6 = por %p147_p5, %p146_p4 }
  0x10   :  { %p149_p7 = pnand %p148_p6, %p142_p3 }
  0x12   :  { %152 = shalt.err (!%p149_p7)
}
  0x13   :  { %32 = dma.hbm_to_vmem [thread:$0]  %s319_s1, 16, %s30_s13, [#allocation6]  }
  0x14   :  { %s153_s29 = scalar_lea.hbm %s318_s0, 256 }
  0x15   :  { %p154_p8 = scmp.ne.s32.totalorder %s318_s0, %s153_s29  ;;  %p157_p9 = scmp.lt.u32.totalorder %s153_s29, %s318_s0 }
  0x17   :  { %p159_p10 = pnand %p157_p9, %p154_p8 }
  0x19   :  { %162 = shalt.err (!%p159_p10)
}
  0x1a   :  { %s163_s7 = scalar_lea.vmem %s251_s15, 256  ;;  %p168_p12 = scmp.lt.s32.totalorder %s251_s15, %s251_s15 }
  0x1b   :  { %p164_p11 = scmp.ne.s32.totalorder %s251_s15, %s163_s7  ;;  %p169_p13 = scmp.lt.s32.totalorder %s163_s7, %s163_s7 }
  0x1d   :  { %p170_p0 = por %p169_p13, %p168_p12 }
  0x1f   :  { %p171_p1 = pnand %p170_p0, %p164_p11 }
  0x21   :  { %174 = shalt.err (!%p171_p1)
}
  0x22   :  { %s227_s1 = smov 128   ;;  %s228_s8 = smov 8  }
  0x23   :  { %22 = dma.hbm_to_vmem [thread:$0]  %s318_s0, 256, %s251_s15, [#allocation3], %s227_s1, %s227_s1, %s228_s8  }
  0x24   :  { %s229_s11 = smov [#allocation7]   ;;  %s175_s16 = scalar_lea.hbm %s320_s2, 16 }
  0x25   :  { %s39_s12 = sshll.u32 %s229_s11, 4  ;;  %p176_p2 = scmp.ne.s32.totalorder %s320_s2, %s175_s16  ;;  %s40_s12 = int_to_ptr.vmem [resolvable:$true] %s39_s12 }
  0x26   :  { %p179_p3 = scmp.lt.u32.totalorder %s175_s16, %s320_s2 }
  0x28   :  { %p181_p4 = pnand %p179_p3, %p176_p2 }
  0x2a   :  { %184 = shalt.err (!%p181_p4)
}
  0x2b   :  { %s185_s21 = scalar_lea.vmem %s40_s12, 16  ;;  %s189_s0 = scalar_lea.vmem %s40_s12, 32 }
  0x2c   :  { %p186_p5 = scmp.ne.s32.totalorder %s40_s12, %s185_s21  ;;  %p190_p6 = scmp.lt.s32.totalorder %s40_s12, %s40_s12 }
  0x2d   :  { %p191_p7 = scmp.lt.s32.totalorder %s189_s0, %s185_s21 }
  0x2f   :  { %p192_p8 = por %p191_p7, %p190_p6 }
  0x31   :  { %p193_p9 = pnand %p192_p8, %p186_p5 }
  0x33   :  { %196 = shalt.err (!%p193_p9)
}
  0x34   :  { %42 = dma.hbm_to_vmem [thread:$0]  %s320_s2, 16, %s40_s12, [#allocation6]  }
  0x35   :  { %219 = dma.done.wait [#allocation3], 256  }
  0x36   :  { %220 = vsyncadd [#allocation3], 4294967040 }
  0x37   :  { %221 = dma.done.wait [#allocation6], 32  }
  0x38   :  { %222 = vsyncadd [#allocation6], 4294967264  ;;  %vm54_vm0 = vcmask 261120   ;;  %v52_v0 = vld [vmem:[#allocation2] sm:$0xff]  ;;  %v53_v1 = vld [vmem:[#allocation2 + $0x8] sm:$0xff]  ;;  %s230_s2 = smov [#allocation8]  }
  0x39   :  { %v55_v2 = vsel %vm54_vm0, %v52_v0, 0.0  ;;  %v58_v3 = vsel %vm54_vm0, %v53_v1, 0.0  ;;  %v119_v21 = vld [vmem:[#allocation5] ss:$0 sm:$0xff]  ;;  %v120_v23 = vld [vmem:[#allocation7] ss:$0 sm:$0xff] }
  0x3a   :  { %56 = vadd.xlane.f32.xlu0 %v55_v2  ;;  %s106_s23 = sshll.u32 %s230_s2, 4  ;;  %s107_s23 = int_to_ptr.vmem [resolvable:$true] %s106_s23 }
  0x3b   :  { %s197_s24 = scalar_lea.vmem %s107_s23, 256  ;;  %p202_p11 = scmp.lt.s32.totalorder %s107_s23, %s107_s23 }
  0x3c   :  { %p198_p10 = scmp.ne.s32.totalorder %s107_s23, %s197_s24  ;;  %p203_p12 = scmp.lt.s32.totalorder %s197_s24, %s197_s24 }
  0x3e   :  { %59 = vadd.xlane.f32.xlu0 %v58_v3  ;;  %p204_p13 = por %p203_p12, %p202_p11 }
  0x40   :  { %p205_p0 = pnand %p204_p13, %p198_p10 }
  0xc7   :  { %v57_v4 = vpop.xlane.xlu0 %56 }
  0xc8   :  { %v61_v5 = vmul.f32 0.03125, %v57_v4 }
  0xca   :  { %v63_v6 = vsub.f32 %v52_v0, %v61_v5 }
  0xcb   :  { %v60_v7 = vpop.xlane.xlu0 %59 }
  0xcc   :  { %v62_v8 = vmul.f32 0.03125, %v60_v7  ;;  %v65_v9 = vmul.f32 %v63_v6, %v63_v6 }
  0xce   :  { %v64_v10 = vsub.f32 %v53_v1, %v62_v8  ;;  %v67_v11 = vsel %vm54_vm0, %v65_v9, 0.0 }
  0xcf   :  { %68 = vadd.xlane.f32.xlu1 %v67_v11 }
  0xd0   :  { %v66_v12 = vmul.f32 %v64_v10, %v64_v10 }
  0xd2   :  { %v70_v13 = vsel %vm54_vm0, %v66_v12, 0.0 }
  0xd3   :  { %71 = vadd.xlane.f32.xlu1 %v70_v13 }
 0x15c   :  { %v69_v14 = vpop.xlane.xlu1 %68 }
 0x15d   :  { %v73_v15 = vmul.f32 0.03125, %v69_v14 }
 0x15f   :  { %v75_v16 = vadd.f32 1e-05, %v73_v15 }
 0x160   :  { %v72_v17 = vpop.xlane.xlu1 %71 }
 0x161   :  { %127 = vrsqrt.f32 %v75_v16  ;;  %v74_v18 = vmul.f32 0.03125, %v72_v17 }
 0x163   :  { %v76_v19 = vadd.f32 1e-05, %v74_v18 }
 0x165   :  { %129 = vrsqrt.f32 %v76_v19 }
 0x16b   :  { %v128_v20 = vpop.eup %127 }
 0x16c   :  { %v79_v22 = vmul.f32 %v128_v20, %v63_v6 }
 0x16e   :  { %v89_v24 = vmul.f32 %v119_v21, %v79_v22 }
 0x16f   :  { %v130_v25 = vpop.eup %129 }
 0x170   :  { %v80_v26 = vmul.f32 %v130_v25, %v64_v10  ;;  %v97_v27 = vadd.f32 %v120_v23, %v89_v24 }
 0x172   :  { %v90_v28 = vmul.f32 %v119_v21, %v80_v26  ;;  %99 = vst.msk [vmem:[#allocation8] sm:$0xff] %vm54_vm0, %v97_v27 }
 0x174   :  { %v98_v29 = vadd.f32 %v120_v23, %v90_v28 }
 0x176   :  { %100 = vst.msk [vmem:[#allocation8 + $0x8] sm:$0xff] %vm54_vm0, %v98_v29 }
 0x177   :  { %208 = shalt.err (!%p205_p0)
}
 0x178   :  { %s209_s27 = scalar_lea.hbm %s321_s3, 256 }
 0x179   :  { %p210_p1 = scmp.ne.s32.totalorder %s321_s3, %s209_s27  ;;  %p213_p2 = scmp.lt.u32.totalorder %s209_s27, %s321_s3 }
 0x17b   :  { %p215_p3 = pnand %p213_p2, %p210_p1 }
 0x17d   :  { %218 = shalt.err (!%p215_p3)
}
 0x17e   :  { %112 = dma.vmem_to_hbm [thread:$0]  %s107_s23, 256, %s321_s3, [#allocation4], %s227_s1, %s227_s1, %s228_s8  }
 0x17f   :  { %223 = dma.done.wait [#allocation4], 256  }
 0x180   :  { %224 = vsyncadd [#allocation4], 4294967040 }
 0x181   :  { %116 = vsyncpa [#allocation3], 1 }
 0x182   :  { %117 = vsyncpa [#allocation6], 1 }
 0x183   :  { %118 = vsyncpa [#allocation4], 1 }

</bundles_post_ra>
